<compile_context>
chip_gen: v7x
topology: tpu7x:2x2x1
jax: 0.10.0
libtpu: 0.0.40
codegen_flags: <defaults>
</compile_context>

<pallas_src>
import functools

import jax
import jax.numpy as jnp
from jax.experimental import pallas as pl
from jax.experimental.pallas import tpu as pltpu


def _round_up(a, b):
    return (a + b - 1) // b * b


# ---------------------------------------------------------------------------
# Grouped SwiGLU expert kernel
# grid = (row_tiles, h_tiles); each row tile holds tokens routed to ONE expert
# (tile_expert_ref, scalar-prefetched, drives the weight index_maps).
# ---------------------------------------------------------------------------
def moe_grouped_expert_kernel(tile_expert_ref,   # (row_tiles,) i32  scalar prefetch (index_maps only)
                              x_ref,             # (Nt, Dp)    bf16  gathered / expert-sorted tokens
                              w13_ref,           # (Dp, 2*Ht)  bf16  [W1 h-tile | W3 h-tile]
                              w2_ref,            # (Ht, Dp)    bf16
                              wt_ref,            # (Nt, 1)     f32   routing weight per row
                              out_ref,           # (Nt, Dp)    x.dtype
                              acc_ref,           # (Nt, Dp)    f32   tile-sized accumulator
                              *, ht):
    hk = pl.program_id(1)

    @pl.when(hk == 0)
    def _():
        acc_ref[...] = jnp.zeros_like(acc_ref)

    x = x_ref[...]                                                          # bf16
    # Single fused up-projection: (Nt, Dp) @ (Dp, 2*Ht) -> [h1 | h3]
    h13 = jnp.dot(x, w13_ref[...], preferred_element_type=jnp.float32)      # (Nt, 2*Ht) f32
    h1 = h13[:, :ht]
    h3 = h13[:, ht:]
    h = (h1 * jax.nn.sigmoid(h1)) * h3                                      # SiLU(W1 x) * (W3 x)
    acc_ref[...] += jnp.dot(h.astype(jnp.bfloat16), w2_ref[...],
                            preferred_element_type=jnp.float32)

    @pl.when(hk == pl.num_programs(1) - 1)
    def _():
        out_ref[...] = (wt_ref[...] * acc_ref[...]).astype(out_ref.dtype)


def _pick_h_tile(Hp, Nt, Dp, budget_bytes):
    """Largest Ht (multiple of 128 dividing Hp) whose double-buffered set fits the budget."""
    for ht in (1024, 512, 256, 128):
        if Hp % ht:
            continue
        vmem = (2 * Nt * Dp * 2            # x blocks (bf16, double buffered)
                + 2 * Dp * (2 * ht) * 2    # fused w13 blocks
                + 2 * ht * Dp * 2          # w2 blocks
                + 2 * Nt * 128 * 4         # wt blocks (lane padded)
                + 2 * Nt * Dp * 4          # out blocks
                + Nt * Dp * 4)             # accumulator scratch
        if vmem <= budget_bytes:
            return ht
    return 128


# ---------------------------------------------------------------------------
# Wrapper
# ---------------------------------------------------------------------------
def moe_feed_forward(x, params, *, top_k, norm_topk_prob=True):
    bsz, seq_len, dim = x.shape
    N = bsz * seq_len
    x_flat = x.reshape(N, dim)

    gate_w = params["gate_w"]                       # (E, dim)  f32
    E = gate_w.shape[0]
    w1, w3, w2 = params["w1"], params["w3"], params["w2"]   # (E+1, dim, H) / (E+1, H, dim), bf16
    E_tot, _, hidden = w1.shape                     # routed experts + 1 shared expert

    # ---- static padded / tile sizes (lane dims -> multiples of 128) -------
    Dp = _round_up(dim, 128)
    Hp = _round_up(hidden, 128)
    Ep = _round_up(E, 128)
    Ng = 256 if N >= 256 else _round_up(N, 8)                    # gate token tile
    Np = _round_up(N, Ng)

    M = N * (top_k + 1)                      # routed assignments + one shared-expert row per token
    Nt = 128 if M >= 1024 else 32            # token (row) tile
    Ht = _pick_h_tile(Hp, Nt, Dp, budget_bytes=40 * 1024 * 1024)
    M_pad = _round_up(M + E_tot * (Nt - 1), Nt)   # each expert group padded to a tile boundary
    n_row_tiles = M_pad // Nt
    n_h_tiles = Hp // Ht

    # ---- MoE gate: softmax(x @ Wg^T), tiled + lane-dense ------------------
    x_pad = jnp.pad(x_flat, ((0, Np - N), (0, Dp - dim)))                  # f32
    wg_pad = jnp.pad(gate_w.T.astype(jnp.float32), ((0, Dp - dim), (0, Ep - E)))

    def gate_kernel(xg_ref, wg_ref, s_ref):
        logits = jnp.dot(xg_ref[...], wg_ref[...], preferred_element_type=jnp.float32)
        col = jax.lax.broadcasted_iota(jnp.int32, logits.shape, 1)
        logits = jnp.where(col < E, logits, -jnp.inf)                      # mask padded experts
        m = jnp.max(logits, axis=-1, keepdims=True)
        ex = jnp.exp(logits - m)
        # per-row uniform scale -> top-k ordering unaffected by approx reciprocal
        s_ref[...] = ex * pl.reciprocal(jnp.sum(ex, axis=-1, keepdims=True), approx=True)

    scores = pl.pallas_call(
        gate_kernel,
        out_shape=jax.ShapeDtypeStruct((Np, Ep), jnp.float32),
        grid_spec=pltpu.PrefetchScalarGridSpec(
            num_scalar_prefetch=0,
            grid=(Np // Ng,),
            in_specs=[pl.BlockSpec((Ng, Dp), lambda i: (i, 0)),
                      pl.BlockSpec((Dp, Ep), lambda i: (0, 0))],
            out_specs=pl.BlockSpec((Ng, Ep), lambda i: (i, 0)),
        ),
        compiler_params=pltpu.CompilerParams(dimension_semantics=("parallel",)),
    )(x_pad, wg_pad)[:N, :E]

    # ---- top-k routing (tiny; plain JAX glue) -----------------------------
    topk_w, topk_i = jax.lax.top_k(scores, top_k)
    if top_k > 1 and norm_topk_prob:
        topk_w = topk_w / (jnp.sum(topk_w, -1, keepdims=True) + 1e-20)

    # ---- grouped routing: sort assignments by expert ----------------------
    tok_ids = jnp.concatenate([jnp.repeat(jnp.arange(N, dtype=jnp.int32), top_k),
                               jnp.arange(N, dtype=jnp.int32)])
    exp_ids = jnp.concatenate([topk_i.reshape(-1).astype(jnp.int32),
                               jnp.full((N,), E, jnp.int32)])              # shared expert = id E
    a_wts = jnp.concatenate([topk_w.reshape(-1), jnp.ones((N,), jnp.float32)])

    order = jnp.argsort(exp_ids)
    s_exp, s_tok, s_wt = exp_ids[order], tok_ids[order], a_wts[order]

    counts = jnp.bincount(exp_ids, length=E_tot).astype(jnp.int32)
    padded = ((counts + Nt - 1) // Nt) * Nt                                # group sizes, tile-aligned
    p_start = jnp.concatenate([jnp.zeros((1,), jnp.int32),
                               jnp.cumsum(padded)[:-1].astype(jnp.int32)])
    g_start = jnp.concatenate([jnp.zeros((1,), jnp.int32),
                               jnp.cumsum(counts)[:-1].astype(jnp.int32)])
    pos = p_start[s_exp] + (jnp.arange(M, dtype=jnp.int32) - g_start[s_exp])

    x_bf16 = x_pad[:N].astype(jnp.bfloat16)                                # (N, Dp)
    xg = jnp.zeros((M_pad, Dp), jnp.bfloat16).at[pos].set(x_bf16[s_tok])
    wtg = jnp.zeros((M_pad, 1), jnp.float32).at[pos].set(s_wt[:, None])    # padding rows -> weight 0
    tokg = jnp.zeros((M_pad,), jnp.int32).at[pos].set(s_tok)

    p_end = jnp.cumsum(padded).astype(jnp.int32)
    row0 = jnp.arange(n_row_tiles, dtype=jnp.int32)[:, None] * Nt
    tile_expert = jnp.minimum(jnp.sum(row0 >= p_end[None, :], axis=1),
                              E_tot - 1).astype(jnp.int32)                 # (row_tiles,)

    # padded, pre-transposed expert weights in bf16 for the MXU.
    # Fuse W1/W3 per h-tile:  w13[:, :, k*2Ht : k*2Ht+2Ht] = [W1 tile k | W3 tile k]
    w1p = jnp.pad(w1, ((0, 0), (0, Dp - dim), (0, Hp - hidden))).astype(jnp.bfloat16)
    w3p = jnp.pad(w3, ((0, 0), (0, Dp - dim), (0, Hp - hidden))).astype(jnp.bfloat16)
    w2p = jnp.pad(w2, ((0, 0), (0, Hp - hidden), (0, Dp - dim))).astype(jnp.bfloat16)
    w13p = jnp.concatenate(
        [w1p.reshape(E_tot, Dp, n_h_tiles, Ht),
         w3p.reshape(E_tot, Dp, n_h_tiles, Ht)],
        axis=-1).reshape(E_tot, Dp, n_h_tiles * 2 * Ht)

    kernel = functools.partial(moe_grouped_expert_kernel, ht=Ht)

    out_grouped = pl.pallas_call(
        kernel,
        out_shape=jax.ShapeDtypeStruct((M_pad, Dp), x.dtype),
        grid_spec=pltpu.PrefetchScalarGridSpec(
            num_scalar_prefetch=1,                       # tile_expert -> SMEM, used by index_maps
            grid=(n_row_tiles, n_h_tiles),               # token tiles (parallel), H tiles (reduction)
            in_specs=[
                pl.BlockSpec((Nt, Dp), lambda i, k, te: (i, 0)),
                pl.BlockSpec((None, Dp, 2 * Ht), lambda i, k, te: (te[i], 0, k)),
                pl.BlockSpec((None, Ht, Dp), lambda i, k, te: (te[i], k, 0)),
                pl.BlockSpec((Nt, 1), lambda i, k, te: (i, 0)),
            ],
            out_specs=pl.BlockSpec((Nt, Dp), lambda i, k, te: (i, 0)),
            scratch_shapes=[pltpu.VMEM((Nt, Dp), jnp.float32)],
        ),
        compiler_params=pltpu.CompilerParams(
            dimension_semantics=("parallel", "arbitrary"),
            vmem_limit_bytes=48 * 1024 * 1024),
        cost_estimate=pl.CostEstimate(
            flops=6 * M_pad * Dp * Hp,
            transcendentals=M_pad * Hp,
            bytes_accessed=3 * E_tot * Dp * Hp * 2 + 6 * M_pad * Dp + 4 * M_pad),
    )(tile_expert, xg, w13p, w2p, wtg)

    # scatter-add back to tokens (padding rows carry weight 0 -> contribute 0)
    y_pad = jnp.zeros((N, Dp), out_grouped.dtype).at[tokg].add(out_grouped)
    return y_pad[:, :dim].reshape(bsz, seq_len, dim)


# ---------------------------------------------------------------------------
# Pure-JAX reference (mirrors the PyTorch eval-path semantics, f32 math)
# ---------------------------------------------------------------------------
def reference(x, params, *, top_k, norm_topk_prob=True):
    bsz, seq_len, dim = x.shape
    N = bsz * seq_len
    xf = x.reshape(N, dim)
    gate_w = params["gate_w"]

    scores = jax.nn.softmax(xf @ gate_w.T, axis=-1)
    topk_w, topk_i = jax.lax.top_k(scores, top_k)
    if top_k > 1 and norm_topk_prob:
        topk_w = topk_w / (jnp.sum(topk_w, -1, keepdims=True) + 1e-20)

    w1 = params["w1"].astype(jnp.float32)
    w3 = params["w3"].astype(jnp.float32)
    w2 = params["w2"].astype(jnp.float32)

    def ffn(xt, a, b, c):
        h1 = xt @ a
        h3 = xt @ b
        return (h1 * jax.nn.sigmoid(h1) * h3) @ c

    all_out = jax.vmap(lambda a, b, c: ffn(xf, a, b, c))(w1[:-1], w3[:-1], w2[:-1])  # (E, N, D)
    y = jnp.zeros_like(xf)
    for k in range(top_k):
        y = y + topk_w[:, k:k + 1] * all_out[topk_i[:, k], jnp.arange(N)]
    y = y + ffn(xf, w1[-1], w3[-1], w2[-1])       # shared expert
    return y.reshape(bsz, seq_len, dim)


# ---------------------------------------------------------------------------
if __name__ == "__main__":
    # LMConfig-like hyperparameters (small)
    dim = 32
    multiple_of = 32
    hidden = 4 * dim
    hidden = int(2 * hidden / 3)
    hidden = multiple_of * ((hidden + multiple_of - 1) // multiple_of)   # -> 96
    n_routed_experts = 4
    num_experts_per_tok = 2
    norm_topk_prob = True
    bsz, seq_len = 2, 8

    key = jax.random.PRNGKey(0)
    k_x, k_g, k1, k2, k3 = jax.random.split(key, 5)

    x = jax.random.normal(k_x, (bsz, seq_len, dim), jnp.float32)

    E_tot = n_routed_experts + 1  # routed + shared
    params = {
        # MoEGate weight (f32): (n_routed_experts, dim)
        "gate_w": jax.random.uniform(k_g, (n_routed_experts, dim), jnp.float32,
                                     minval=-1.0, maxval=1.0) / jnp.sqrt(dim),
        # Expert weights stored pre-transposed (x @ W) and in bf16 (MXU-native):
        #   w1, w3: (E+1, dim, hidden)   w2: (E+1, hidden, dim)
        "w1": (jax.random.normal(k1, (E_tot, dim, hidden), jnp.float32)
               / jnp.sqrt(dim)).astype(jnp.bfloat16),
        "w3": (jax.random.normal(k2, (E_tot, dim, hidden), jnp.float32)
               / jnp.sqrt(dim)).astype(jnp.bfloat16),
        "w2": (jax.random.normal(k3, (E_tot, hidden, dim), jnp.float32)
               / jnp.sqrt(hidden)).astype(jnp.bfloat16),
    }

    y = moe_feed_forward(x, params, top_k=num_experts_per_tok,
                         norm_topk_prob=norm_topk_prob)
    y = jax.block_until_ready(y)

    y_ref = reference(x, params, top_k=num_experts_per_tok,
                      norm_topk_prob=norm_topk_prob)
    assert y.shape == (bsz, seq_len, dim)
    max_err = jnp.max(jnp.abs(y - y_ref))
    # bf16 MXU inputs with f32 accumulation vs f32 reference -> loose-ish tolerance
    assert jnp.allclose(y, y_ref, atol=2e-2, rtol=2e-2), f"mismatch vs reference (max abs err {max_err})"

    # TODO(synk): training-path aux_loss / dropout not implemented (eval-path semantics only).
    print("KERNEL_OK")
</pallas_src>

<mosaic_0001>
module attributes {stable_mosaic.version = 11 : i64} {
  func.func @gate_kernel(%arg0: i32, %arg1: memref<16x128xf32, #tpu.memory_space<vmem>>, %arg2: memref<128x128xf32, #tpu.memory_space<vmem>>, %arg3: memref<16x128xf32, #tpu.memory_space<vmem>>) attributes {dimension_semantics = [#tpu.dimension_semantics<parallel>], iteration_bounds = array<i64: 1>, scalar_prefetch = 0 : i64, scratch_operands = 0 : i64, tpu.core_type = #tpu.core_type<tc>, window_params = [{transform_indices = @transform_0, window_bounds = array<i64: 16, 128>}, {pipeline_mode = #tpu.pipeline_mode<synchronous>, transform_indices = @transform_1, window_bounds = array<i64: 128, 128>}, {transform_indices = @transform_2, window_bounds = array<i64: 16, 128>}]} {
    %c0 = arith.constant 0 : index
    %c0_0 = arith.constant 0 : index
    %0 = vector.load %arg1[%c0, %c0_0] : memref<16x128xf32, #tpu.memory_space<vmem>>, vector<16x128xf32>
    %c0_1 = arith.constant 0 : index
    %c0_2 = arith.constant 0 : index
    %1 = vector.load %arg2[%c0_1, %c0_2] : memref<128x128xf32, #tpu.memory_space<vmem>>, vector<128x128xf32>
    %cst = arith.constant dense<0.000000e+00> : vector<16x128xf32>
    %2 = tpu.matmul %0, %1, %cst {dimension_numbers = #tpu.dot_dimension_numbers<[1], [0], [0], [1], [0, 0, 1, 1], [], []>} : vector<16x128xf32>, vector<128x128xf32>, vector<16x128xf32> -> vector<16x128xf32>
    %3 = tpu.iota {dimensions = array<i32: 1>} : vector<16x128xi32>
    %c4_i32 = arith.constant 4 : i32
    %4 = vector.broadcast %c4_i32 : i32 to vector<16x128xi32>
    %5 = arith.cmpi slt, %3, %4 : vector<16x128xi32>
    %cst_3 = arith.constant 0xFF800000 : f32
    %6 = vector.broadcast %cst_3 : f32 to vector<16x128xf32>
    %7 = arith.select %5, %2, %6 : vector<16x128xi1>, vector<16x128xf32>
    %cst_4 = arith.constant dense<0xFF800000> : vector<16xf32>
    %8 = vector.multi_reduction <maximumf>, %7, %cst_4 [1] : vector<16x128xf32> to vector<16xf32>
    %9 = vector.shape_cast %8 : vector<16xf32> to vector<16x1xf32>
    %10 = vector.broadcast %9 : vector<16x1xf32> to vector<16x128xf32>
    %11 = arith.subf %7, %10 : vector<16x128xf32>
    %12 = math.exp %11 : vector<16x128xf32>
    %cst_5 = arith.constant dense<0.000000e+00> : vector<16xf32>
    %13 = vector.multi_reduction <add>, %12, %cst_5 [1] : vector<16x128xf32> to vector<16xf32>
    %14 = vector.shape_cast %13 : vector<16xf32> to vector<16x1xf32>
    %15 = tpu.reciprocal %14 {approx = true} : vector<16x1xf32> -> vector<16x1xf32>
    %16 = vector.broadcast %15 : vector<16x1xf32> to vector<16x128xf32>
    %17 = arith.mulf %12, %16 : vector<16x128xf32>
    %c0_6 = arith.constant 0 : index
    %c0_7 = arith.constant 0 : index
    %18 = vector.load %arg3[%c0_6, %c0_7] : memref<16x128xf32, #tpu.memory_space<vmem>>, vector<16x128xf32>
    tpu.vector_store %arg3[%c0_6, %c0_7], %17 {strides = array<i32>} : memref<16x128xf32, #tpu.memory_space<vmem>>, vector<16x128xf32>,
    return
  }
  func.func @transform_0(%arg0: i32) -> (i32, i32) {
    %c0_i32 = arith.constant 0 : i32
    %c0_i32_0 = arith.constant 0 : i32
    return %arg0, %c0_i32 : i32, i32
  }
  func.func @transform_1(%arg0: i32) -> (i32, i32) {
    %c0_i32 = arith.constant 0 : i32
    %c0_i32_0 = arith.constant 0 : i32
    %c0_i32_1 = arith.constant 0 : i32
    return %c0_i32, %c0_i32_0 : i32, i32
  }
  func.func @transform_2(%arg0: i32) -> (i32, i32) {
    %c0_i32 = arith.constant 0 : i32
    %c0_i32_0 = arith.constant 0 : i32
    return %arg0, %c0_i32 : i32, i32
  }
}

</mosaic_0001>

<bundles_post_ra>
// kernel: tpu_custom_call.1
= control target key start
LH: loop header
LB: loop body
LE: loop exit
PB: predicated region body
PF: predicated region fallthrough
CT: control target
= control target key end

     0   :  { %7 = vsyncpa [#allocation3], 0  ;;  %s411_s0 = inlined_call_operand.hbm [shape: f32[16,128], index: 0, kind: input, shape index: {}]   ;;  %s412_s1 = inlined_call_operand.hbm [shape: f32[128,128], index: 1, kind: input, shape index: {}]   ;;  %s413_s2 = inlined_call_operand.hbm [shape: f32[16,128], index: 2, kind: output, shape index: {}]  }
   0x1   :  { %8 = vsyncpa [#allocation6], 0 }
   0x2   :  { %9 = vsyncpa [#allocation4], 0  ;;  %s346_s9 = smov [#allocation2]   ;;  %s274_s13 = scalar_lea.hbm %s411_s0, 256 }
   0x3   :  { %s15_s10 = sshll.u32 %s346_s9, 4  ;;  %p275_p0 = scmp.ne.s32.totalorder %s411_s0, %s274_s13  ;;  %s16_s10 = int_to_ptr.vmem [resolvable:$true] %s15_s10 }
   0x4   :  { %p278_p1 = scmp.lt.u32.totalorder %s274_s13, %s411_s0 }
   0x6   :  { %p280_p2 = pnand %p278_p1, %p275_p0 }
   0x8   :  { %283 = shalt.err (!%p280_p2)
}
   0x9   :  { %s284_s18 = scalar_lea.vmem %s16_s10, 256  ;;  %p289_p4 = scmp.lt.s32.totalorder %s16_s10, %s16_s10 }
   0xa   :  { %p285_p3 = scmp.ne.s32.totalorder %s16_s10, %s284_s18  ;;  %p290_p5 = scmp.lt.s32.totalorder %s284_s18, %s284_s18 }
   0xc   :  { %p291_p6 = por %p290_p5, %p289_p4 }
   0xe   :  { %p292_p7 = pnand %p291_p6, %p285_p3 }
  0x10   :  { %295 = shalt.err (!%p292_p7)
}
  0x11   :  { %s347_s19 = smov 128   ;;  %s348_s20 = smov 8  }
  0x12   :  { %21 = dma.hbm_to_vmem [thread:$0]  %s411_s0, 256, %s16_s10, [#allocation3], %s347_s19, %s347_s19, %s348_s20  }
  0x13   :  { %s349_s23 = smov [#allocation5]   ;;  %s296_s27 = scalar_lea.hbm %s412_s1, 2048 }
  0x14   :  { %s27_s24 = sshll.u32 %s349_s23, 4  ;;  %p297_p8 = scmp.ne.s32.totalorder %s412_s1, %s296_s27  ;;  %s28_s24 = int_to_ptr.vmem [resolvable:$true] %s27_s24 }
  0x15   :  { %p300_p9 = scmp.lt.u32.totalorder %s296_s27, %s412_s1 }
  0x17   :  { %p302_p10 = pnand %p300_p9, %p297_p8 }
  0x19   :  { %305 = shalt.err (!%p302_p10)
}
  0x1a   :  { %s306_s4 = scalar_lea.vmem %s28_s24, 2048  ;;  %p311_p12 = scmp.lt.s32.totalorder %s28_s24, %s28_s24 }
  0x1b   :  { %p307_p11 = scmp.ne.s32.totalorder %s28_s24, %s306_s4  ;;  %p312_p13 = scmp.lt.s32.totalorder %s306_s4, %s306_s4 }
  0x1d   :  { %p313_p0 = por %p312_p13, %p311_p12 }
  0x1f   :  { %p314_p1 = pnand %p313_p0, %p307_p11 }
  0x21   :  { %317 = shalt.err (!%p314_p1)
}
  0x22   :  { %33 = dma.hbm_to_vmem [thread:$0]  %s412_s1, 2048, %s28_s24, [#allocation6], %s347_s19, %s347_s19, %s348_s20  }
  0x23   :  { %340 = dma.done.wait [#allocation3], 256  }
  0x24   :  { %341 = vsyncadd [#allocation3], 4294967040 }
  0x25   :  { %342 = dma.done.wait [#allocation6], 2048  }
  0x26   :  { %343 = vsyncadd [#allocation6], 4294965248  ;;  %v42_v0 = vld [vmem:[#allocation5] sm:$0xff]  ;;  %v43_v1 = vld [vmem:[#allocation5 + $0x8] sm:$0xff]  ;;  %v133_v26 = vlaneseq  ;;  %s350_s1 = smov [#allocation7]  }
  0x27   :  { %v44_v2 = vld [vmem:[#allocation5 + $0x10] sm:$0xff]  ;;  %v229_v3 = vpack.c.bf16 %v43_v1, %v42_v0  ;;  %v45_v4 = vld [vmem:[#allocation5 + $0x18] sm:$0xff]  ;;  %v46_v6 = vld [vmem:[#allocation5 + $0x20] sm:$0xff]  ;;  %s163_s6 = sshll.u32 %s350_s1, 4  ;;  %s164_s6 = int_to_ptr.vmem [resolvable:$true] %s163_s6 }
  0x28   :  { %v233_v5 = vpack.c.bf16 %v45_v4, %v44_v2  ;;  %v47_v7 = vld [vmem:[#allocation5 + $0x28] sm:$0xff]  ;;  %v40_v9 = vld [vmem:[#allocation2] sm:$0xff]  ;;  %v49_v11 = vld [vmem:[#allocation5 + $0x38] sm:$0xff]  ;;  %v134_v27 = vand.u32 127, %v133_v26  ;;  %s318_s7 = scalar_lea.vmem %s164_s6, 256  ;;  %p323_p3 = scmp.lt.s32.totalorder %s164_s6, %s164_s6 }
  0x29   :  { %230 = vmatprep.subr.bf16.mxu0 %v229_v3  ;;  %v237_v8 = vpack.c.bf16 %v47_v7, %v46_v6  ;;  %v48_v10 = vld [vmem:[#allocation5 + $0x30] sm:$0xff]  ;;  %226 = vmatprep.mubr.f32.mxu0 %v40_v9  ;;  %v50_v13 = vld [vmem:[#allocation5 + $0x40] sm:$0xff]  ;;  %v51_v14 = vld [vmem:[#allocation5 + $0x48] sm:$0xff]  ;;  %p319_p2 = scmp.ne.s32.totalorder %s164_s6, %s318_s7  ;;  %p324_p4 = scmp.lt.s32.totalorder %s318_s7, %s318_s7 }
  0x2a   :  { %232 = vmatpush3.bf16.msra.mxu0 %v229_v3  ;;  %v241_v12 = vpack.c.bf16 %v49_v11, %v48_v10  ;;  %v245_v15 = vpack.c.bf16 %v51_v14, %v50_v13  ;;  %v52_v16 = vld [vmem:[#allocation5 + $0x50] sm:$0xff]  ;;  %v53_v17 = vld [vmem:[#allocation5 + $0x58] sm:$0xff]  ;;  %v54_v19 = vld [vmem:[#allocation5 + $0x60] sm:$0xff]  ;;  %vm135_vm0 = vcmp.lt.s32.totalorder %v134_v27, 4 }
  0x2b   :  { %234 = vmatprep.subr.bf16.mxu0 %v233_v5  ;;  %v249_v18 = vpack.c.bf16 %v53_v17, %v52_v16  ;;  %v55_v20 = vld [vmem:[#allocation5 + $0x68] sm:$0xff]  ;;  %v56_v22 = vld [vmem:[#allocation5 + $0x70] sm:$0xff]  ;;  %v57_v23 = vld [vmem:[#allocation5 + $0x78] sm:$0xff]  ;;  %p325_p5 = por %p324_p4, %p323_p3 }
  0x2c   :  { %v253_v21 = vpack.c.bf16 %v55_v20, %v54_v19  ;;  %v257_v24 = vpack.c.bf16 %v57_v23, %v56_v22  ;;  %v41_v25 = vld [vmem:[#allocation2 + $0x8] sm:$0xff] }
  0x2d   :  { %p326_p6 = pnand %p325_p5, %p319_p2 }
  0x2e   :  { %236 = vmatpush3.bf16.msra.mxu0 %v233_v5 }
  0x2f   :  { %238 = vmatprep.subr.bf16.mxu0 %v237_v8 }
  0x32   :  { %240 = vmatpush3.bf16.msra.mxu0 %v237_v8 }
  0x33   :  { %242 = vmatprep.subr.bf16.mxu0 %v241_v12 }
  0x36   :  { %244 = vmatpush3.bf16.msra.mxu0 %v241_v12 }
  0x37   :  { %246 = vmatprep.subr.bf16.mxu0 %v245_v15 }
  0x3a   :  { %248 = vmatpush3.bf16.msra.mxu0 %v245_v15 }
  0x3b   :  { %250 = vmatprep.subr.bf16.mxu0 %v249_v18 }
  0x3e   :  { %252 = vmatpush3.bf16.msra.mxu0 %v249_v18 }
  0x3f   :  { %254 = vmatprep.subr.bf16.mxu0 %v253_v21 }
  0x42   :  { %256 = vmatpush3.bf16.msra.mxu0 %v253_v21 }
  0x43   :  { %258 = vmatprep.subr.bf16.mxu0 %v257_v24 }
  0x46   :  { %260 = vmatpush3.bf16.msra.mxu0 %v257_v24 }
  0x49   :  { %227 = vmatmul.mubr.f32.vlgmr.msra.gmra.mrb[0].mxu0 %v41_v25 }
 0x11c   :  { %v228_v28 = vpop.f32.mrb[0].mxu0 }
 0x11d   :  { %v124_v29 = vpop.f32.mrb[1].mxu0  ;;  %v137_v31 = vsel %vm135_vm0, %v228_v28, -inf }
 0x11e   :  { %v136_v30 = vsel %vm135_vm0, %v124_v29, -inf }
 0x11f   :  { %138 = vmax.xlane.f32.xlu0 %v136_v30 }
 0x123   :  { %140 = vmax.xlane.f32.xlu0 %v137_v31 }
 0x1ac   :  { %v139_v32 = vpop.xlane.xlu0 %138 }
 0x1ad   :  { %v142_v33 = vsub.f32 %v136_v30, %v139_v32 }
 0x1af   :  { %v144_v34 = vmul.f32 1.442695, %v142_v33 }
 0x1b0   :  { %v141_v35 = vpop.xlane.xlu0 %140 }
 0x1b1   :  { %266 = vpow2.f32 %v144_v34  ;;  %v143_v36 = vsub.f32 %v137_v31, %v141_v35 }
 0x1b3   :  { %v146_v37 = vmul.f32 1.442695, %v143_v36 }
 0x1b5   :  { %268 = vpow2.f32 %v146_v37 }
 0x1bb   :  { %v267_v38 = vpop.eup %266 }
 0x1bc   :  { %148 = vadd.xlane.f32.xlu1 %v267_v38 }
 0x1bf   :  { %v269_v39 = vpop.eup %268 }
 0x1c0   :  { %150 = vadd.xlane.f32.xlu1 %v269_v39 }
 0x249   :  { %v149_v40 = vpop.xlane.xlu1 %148 }
 0x24a   :  { %270 = vrcp.f32 %v149_v40 }
 0x24d   :  { %v151_v41 = vpop.xlane.xlu1 %150 }
 0x24e   :  { %272 = vrcp.f32 %v151_v41 }
 0x254   :  { %v271_v42 = vpop.eup %270 }
 0x255   :  { %v154_v43 = vmul.f32 %v271_v42, %v267_v38 }
 0x257   :  { %156 = vst [vmem:[#allocation7] sm:$0xff] %v154_v43 }
 0x258   :  { %v273_v44 = vpop.eup %272 }
 0x259   :  { %v155_v45 = vmul.f32 %v273_v44, %v269_v39 }
 0x25b   :  { %157 = vst [vmem:[#allocation7 + $0x8] sm:$0xff] %v155_v45 }
 0x25c   :  { %329 = shalt.err (!%p326_p6)
}
 0x25d   :  { %s330_s10 = scalar_lea.hbm %s413_s2, 256 }
 0x25e   :  { %p331_p7 = scmp.ne.s32.totalorder %s413_s2, %s330_s10  ;;  %p334_p8 = scmp.lt.u32.totalorder %s330_s10, %s413_s2 }
 0x260   :  { %p336_p9 = pnand %p334_p8, %p331_p7 }
 0x262   :  { %339 = shalt.err (!%p336_p9)
}
 0x263   :  { %169 = dma.vmem_to_hbm [thread:$0]  %s164_s6, 256, %s413_s2, [#allocation4], %s347_s19, %s347_s19, %s348_s20  }
 0x264   :  { %344 = dma.done.wait [#allocation4], 256  }
 0x265   :  { %345 = vsyncadd [#allocation4], 4294967040 }
 0x266   :  { %173 = vsyncpa [#allocation3], 1 }
 0x267   :  { %174 = vsyncpa [#allocation6], 1 }
 0x268   :  { %175 = vsyncpa [#allocation4], 1 }

</bundles_post_ra>
